<compile_context>
chip_gen: v5e
topology: v5e:2x2
jax: 0.10.0
libtpu: 0.0.40
codegen_flags: <defaults>
</compile_context>

<pallas_src>
import jax
import jax.numpy as jnp
from jax.experimental import pallas as pl
from jax.experimental.pallas import tpu as pltpu


def _round_up(n, m):
    return ((n + m - 1) // m) * m


def mlp_kernel(x_ref,
               w1_ref, b1_ref,
               w2_ref, b2_ref,
               w3_ref, b3_ref,
               w4_ref, b4_ref,
               o_ref):
    x = x_ref[...]                                                   # (tile_b, 4) f32

    # fc1 + relu
    h = jnp.dot(x, w1_ref[...], preferred_element_type=jnp.float32) + b1_ref[...]
    h = jnp.maximum(h, 0.0)

    # fc2 + relu
    h = jnp.dot(h, w2_ref[...], preferred_element_type=jnp.float32) + b2_ref[...]
    h = jnp.maximum(h, 0.0)

    # fc3 + relu
    h = jnp.dot(h, w3_ref[...], preferred_element_type=jnp.float32) + b3_ref[...]
    h = jnp.maximum(h, 0.0)

    # output layer (padded to 8 lanes) + sigmoid (exp on EUP)
    z = jnp.dot(h, w4_ref[...], preferred_element_type=jnp.float32) + b4_ref[...]
    o_ref[...] = jax.nn.sigmoid(z).astype(o_ref.dtype)              # (tile_b, 8)


def network_forward(x, params, *, tile_b=4096):
    (w1, b1), (w2, b2), (w3, b3), (w4, b4) = params
    B, in_dim = x.shape
    hidden = w2.shape[0]
    out_dim = w4.shape[1]

    # Batch tile: multiple of 8 sublanes, at least 8 rows, and capped at
    # ~half the batch so the grid has >=2 steps (lets v7x's 2nd TC join).
    half_b = _round_up(pl.cdiv(B, 2), 8)
    tile_b = max(8, min(tile_b, half_b))

    grid_b = pl.cdiv(B, tile_b)
    b_pad = grid_b * tile_b          # output rows padded -> output writes always in-bounds

    # Narrow lane padding of the 5-wide output layer to 8 columns (block last
    # dim == full array dim, so the (8,128) rule is satisfied). Padded output
    # columns hold sigmoid(0) = 0.5 and are sliced away below.
    out_pad = _round_up(out_dim, 8)
    w4p = jnp.zeros((hidden, out_pad), w4.dtype).at[:, :out_dim].set(w4)
    b4p = jnp.zeros((1, out_pad), b4.dtype).at[:, :out_dim].set(b4)

    # Activations tiled over batch; weights/biases fully VMEM-resident
    # (constant block index -> DMA'd once, no per-step refetch).
    x_spec = pl.BlockSpec((tile_b, in_dim), lambda i: (i, 0))
    o_spec = pl.BlockSpec((tile_b, out_pad), lambda i: (i, 0))
    resident = lambda a: pl.BlockSpec(a.shape, lambda i: (0, 0))

    # VMEM budget: x / h / out tiles all occupy tile_b * 128 lanes * 4 B in
    # VMEM; ~2 in + 2 out double buffers + a few live activation temps.
    vmem_limit = int(min(64 * 2**20, max(16 * 2**20, 12 * tile_b * 512)))

    out = pl.pallas_call(
        mlp_kernel,
        out_shape=jax.ShapeDtypeStruct((b_pad, out_pad), jnp.float32),
        grid_spec=pltpu.PrefetchScalarGridSpec(
            num_scalar_prefetch=0,
            grid=(grid_b,),
            in_specs=[
                x_spec,
                resident(w1), resident(b1),
                resident(w2), resident(b2),
                resident(w3), resident(b3),
                resident(w4p), resident(b4p),
            ],
            out_specs=o_spec,
        ),
        compiler_params=pltpu.CompilerParams(
            dimension_semantics=("parallel",),   # megacore sharding on v7x
            vmem_limit_bytes=vmem_limit,
        ),
    )(x, w1, b1, w2, b2, w3, b3, w4p, b4p)

    return out[:B, :out_dim]


def init_linear(key, fan_in, fan_out):
    """Deterministic init mimicking nn.Linear's uniform(-1/sqrt(fan_in), ...)."""
    kw, kb = jax.random.split(key)
    bound = 1.0 / jnp.sqrt(jnp.float32(fan_in))
    w = jax.random.uniform(kw, (fan_in, fan_out), jnp.float32, -bound, bound)  # (in, out)
    b = jax.random.uniform(kb, (1, fan_out), jnp.float32, -bound, bound)
    return w, b


def _reference(x, params):
    h = x
    for (w, b) in params[:-1]:
        h = jnp.maximum(h @ w + b, 0.0)
    return jax.nn.sigmoid(h @ params[-1][0] + params[-1][1])


if __name__ == "__main__":
    key = jax.random.PRNGKey(0)
    k_x, k_x2, k1, k2, k3, k4 = jax.random.split(key, 6)

    params = (
        init_linear(k1, 4, 50),
        init_linear(k2, 50, 50),
        init_linear(k3, 50, 50),
        init_linear(k4, 50, 5),
    )

    # Small deterministic check (B=8, in=4), single grid step.
    x = jax.random.normal(k_x, (8, 4), jnp.float32)
    out = jax.block_until_ready(network_forward(x, params))
    ref = _reference(x, params)
    assert out.shape == (8, 5)
    assert jnp.allclose(out, ref, atol=1e-5, rtol=1e-5)

    # Non-multiple batch: exercises cdiv grid, OOB read on the last input
    # block, row-padded output, and a >=2-step parallel batch grid.
    x2 = jax.random.normal(k_x2, (1000, 4), jnp.float32)
    out2 = jax.block_until_ready(network_forward(x2, params, tile_b=256))
    ref2 = _reference(x2, params)
    assert out2.shape == (1000, 5)
    assert jnp.allclose(out2, ref2, atol=1e-5, rtol=1e-5)

    print("KERNEL_OK")
</pallas_src>

<mosaic_0001>
module attributes {stable_mosaic.version = 11 : i64} {
  func.func @mlp_kernel(%arg0: i32, %arg1: memref<8x4xf32, #tpu.memory_space<vmem>>, %arg2: memref<4x50xf32, #tpu.memory_space<vmem>>, %arg3: memref<1x50xf32, #tpu.memory_space<vmem>>, %arg4: memref<50x50xf32, #tpu.memory_space<vmem>>, %arg5: memref<1x50xf32, #tpu.memory_space<vmem>>, %arg6: memref<50x50xf32, #tpu.memory_space<vmem>>, %arg7: memref<1x50xf32, #tpu.memory_space<vmem>>, %arg8: memref<50x8xf32, #tpu.memory_space<vmem>>, %arg9: memref<1x8xf32, #tpu.memory_space<vmem>>, %arg10: memref<8x8xf32, #tpu.memory_space<vmem>>) attributes {dimension_semantics = [#tpu.dimension_semantics<parallel>], iteration_bounds = array<i64: 1>, scalar_prefetch = 0 : i64, scratch_operands = 0 : i64, tpu.core_type = #tpu.core_type<tc>, window_params = [{transform_indices = @transform_0, window_bounds = array<i64: 8, 4>}, {pipeline_mode = #tpu.pipeline_mode<synchronous>, transform_indices = @transform_1, window_bounds = array<i64: 4, 50>}, {pipeline_mode = #tpu.pipeline_mode<synchronous>, transform_indices = @transform_2, window_bounds = array<i64: 1, 50>}, {pipeline_mode = #tpu.pipeline_mode<synchronous>, transform_indices = @transform_3, window_bounds = array<i64: 50, 50>}, {pipeline_mode = #tpu.pipeline_mode<synchronous>, transform_indices = @transform_4, window_bounds = array<i64: 1, 50>}, {pipeline_mode = #tpu.pipeline_mode<synchronous>, transform_indices = @transform_5, window_bounds = array<i64: 50, 50>}, {pipeline_mode = #tpu.pipeline_mode<synchronous>, transform_indices = @transform_6, window_bounds = array<i64: 1, 50>}, {pipeline_mode = #tpu.pipeline_mode<synchronous>, transform_indices = @transform_7, window_bounds = array<i64: 50, 8>}, {pipeline_mode = #tpu.pipeline_mode<synchronous>, transform_indices = @transform_8, window_bounds = array<i64: 1, 8>}, {transform_indices = @transform_9, window_bounds = array<i64: 8, 8>}]} {
    %c0 = arith.constant 0 : index
    %c0_0 = arith.constant 0 : index
    %0 = vector.load %arg1[%c0, %c0_0] : memref<8x4xf32, #tpu.memory_space<vmem>>, vector<8x4xf32>
    %c0_1 = arith.constant 0 : index
    %c0_2 = arith.constant 0 : index
    %1 = vector.load %arg2[%c0_1, %c0_2] : memref<4x50xf32, #tpu.memory_space<vmem>>, vector<4x50xf32>
    %cst = arith.constant dense<0.000000e+00> : vector<8x50xf32>
    %2 = tpu.matmul %0, %1, %cst {dimension_numbers = #tpu.dot_dimension_numbers<[1], [0], [0], [1], [0, 0, 1, 1], [], []>} : vector<8x4xf32>, vector<4x50xf32>, vector<8x50xf32> -> vector<8x50xf32>
    %c0_3 = arith.constant 0 : index
    %c0_4 = arith.constant 0 : index
    %3 = vector.load %arg3[%c0_3, %c0_4] : memref<1x50xf32, #tpu.memory_space<vmem>>, vector<1x50xf32>
    %4 = vector.broadcast %3 : vector<1x50xf32> to vector<8x50xf32>
    %5 = arith.addf %2, %4 : vector<8x50xf32>
    %cst_5 = arith.constant 0.000000e+00 : f32
    %6 = vector.broadcast %cst_5 : f32 to vector<8x50xf32>
    %7 = arith.maximumf %5, %6 : vector<8x50xf32>
    %c0_6 = arith.constant 0 : index
    %c0_7 = arith.constant 0 : index
    %8 = vector.load %arg4[%c0_6, %c0_7] : memref<50x50xf32, #tpu.memory_space<vmem>>, vector<50x50xf32>
    %cst_8 = arith.constant dense<0.000000e+00> : vector<8x50xf32>
    %9 = tpu.matmul %7, %8, %cst_8 {dimension_numbers = #tpu.dot_dimension_numbers<[1], [0], [0], [1], [0, 0, 1, 1], [], []>} : vector<8x50xf32>, vector<50x50xf32>, vector<8x50xf32> -> vector<8x50xf32>
    %c0_9 = arith.constant 0 : index
    %c0_10 = arith.constant 0 : index
    %10 = vector.load %arg5[%c0_9, %c0_10] : memref<1x50xf32, #tpu.memory_space<vmem>>, vector<1x50xf32>
    %11 = vector.broadcast %10 : vector<1x50xf32> to vector<8x50xf32>
    %12 = arith.addf %9, %11 : vector<8x50xf32>
    %cst_11 = arith.constant 0.000000e+00 : f32
    %13 = vector.broadcast %cst_11 : f32 to vector<8x50xf32>
    %14 = arith.maximumf %12, %13 : vector<8x50xf32>
    %c0_12 = arith.constant 0 : index
    %c0_13 = arith.constant 0 : index
    %15 = vector.load %arg6[%c0_12, %c0_13] : memref<50x50xf32, #tpu.memory_space<vmem>>, vector<50x50xf32>
    %cst_14 = arith.constant dense<0.000000e+00> : vector<8x50xf32>
    %16 = tpu.matmul %14, %15, %cst_14 {dimension_numbers = #tpu.dot_dimension_numbers<[1], [0], [0], [1], [0, 0, 1, 1], [], []>} : vector<8x50xf32>, vector<50x50xf32>, vector<8x50xf32> -> vector<8x50xf32>
    %c0_15 = arith.constant 0 : index
    %c0_16 = arith.constant 0 : index
    %17 = vector.load %arg7[%c0_15, %c0_16] : memref<1x50xf32, #tpu.memory_space<vmem>>, vector<1x50xf32>
    %18 = vector.broadcast %17 : vector<1x50xf32> to vector<8x50xf32>
    %19 = arith.addf %16, %18 : vector<8x50xf32>
    %cst_17 = arith.constant 0.000000e+00 : f32
    %20 = vector.broadcast %cst_17 : f32 to vector<8x50xf32>
    %21 = arith.maximumf %19, %20 : vector<8x50xf32>
    %c0_18 = arith.constant 0 : index
    %c0_19 = arith.constant 0 : index
    %22 = vector.load %arg8[%c0_18, %c0_19] : memref<50x8xf32, #tpu.memory_space<vmem>>, vector<50x8xf32>
    %cst_20 = arith.constant dense<0.000000e+00> : vector<8x8xf32>
    %23 = tpu.matmul %21, %22, %cst_20 {dimension_numbers = #tpu.dot_dimension_numbers<[1], [0], [0], [1], [0, 0, 1, 1], [], []>} : vector<8x50xf32>, vector<50x8xf32>, vector<8x8xf32> -> vector<8x8xf32>
    %c0_21 = arith.constant 0 : index
    %c0_22 = arith.constant 0 : index
    %24 = vector.load %arg9[%c0_21, %c0_22] : memref<1x8xf32, #tpu.memory_space<vmem>>, vector<1x8xf32>
    %25 = vector.broadcast %24 : vector<1x8xf32> to vector<8x8xf32>
    %26 = arith.addf %23, %25 : vector<8x8xf32>
    %27 = arith.negf %26 : vector<8x8xf32>
    %28 = math.exp %27 : vector<8x8xf32>
    %cst_23 = arith.constant 1.000000e+00 : f32
    %29 = vector.broadcast %cst_23 : f32 to vector<8x8xf32>
    %30 = arith.addf %29, %28 : vector<8x8xf32>
    %31 = arith.divf %29, %30 : vector<8x8xf32>
    %c0_24 = arith.constant 0 : index
    %c0_25 = arith.constant 0 : index
    %32 = vector.load %arg10[%c0_24, %c0_25] : memref<8x8xf32, #tpu.memory_space<vmem>>, vector<8x8xf32>
    tpu.vector_store %arg10[%c0_24, %c0_25], %31 {strides = array<i32>} : memref<8x8xf32, #tpu.memory_space<vmem>>, vector<8x8xf32>,
    return
  }
  func.func @transform_0(%arg0: i32) -> (i32, i32) {
    %c0_i32 = arith.constant 0 : i32
    %c0_i32_0 = arith.constant 0 : i32
    return %arg0, %c0_i32 : i32, i32
  }
  func.func @transform_1(%arg0: i32) -> (i32, i32) {
    %c0_i32 = arith.constant 0 : i32
    %c0_i32_0 = arith.constant 0 : i32
    %c0_i32_1 = arith.constant 0 : i32
    return %c0_i32, %c0_i32_0 : i32, i32
  }
  func.func @transform_2(%arg0: i32) -> (i32, i32) {
    %c0_i32 = arith.constant 0 : i32
    %c0_i32_0 = arith.constant 0 : i32
    %c0_i32_1 = arith.constant 0 : i32
    return %c0_i32, %c0_i32_0 : i32, i32
  }
  func.func @transform_3(%arg0: i32) -> (i32, i32) {
    %c0_i32 = arith.constant 0 : i32
    %c0_i32_0 = arith.constant 0 : i32
    %c0_i32_1 = arith.constant 0 : i32
    return %c0_i32, %c0_i32_0 : i32, i32
  }
  func.func @transform_4(%arg0: i32) -> (i32, i32) {
    %c0_i32 = arith.constant 0 : i32
    %c0_i32_0 = arith.constant 0 : i32
    %c0_i32_1 = arith.constant 0 : i32
    return %c0_i32, %c0_i32_0 : i32, i32
  }
  func.func @transform_5(%arg0: i32) -> (i32, i32) {
    %c0_i32 = arith.constant 0 : i32
    %c0_i32_0 = arith.constant 0 : i32
    %c0_i32_1 = arith.constant 0 : i32
    return %c0_i32, %c0_i32_0 : i32, i32
  }
  func.func @transform_6(%arg0: i32) -> (i32, i32) {
    %c0_i32 = arith.constant 0 : i32
    %c0_i32_0 = arith.constant 0 : i32
    %c0_i32_1 = arith.constant 0 : i32
    return %c0_i32, %c0_i32_0 : i32, i32
  }
  func.func @transform_7(%arg0: i32) -> (i32, i32) {
    %c0_i32 = arith.constant 0 : i32
    %c0_i32_0 = arith.constant 0 : i32
    %c0_i32_1 = arith.constant 0 : i32
    return %c0_i32, %c0_i32_0 : i32, i32
  }
  func.func @transform_8(%arg0: i32) -> (i32, i32) {
    %c0_i32 = arith.constant 0 : i32
    %c0_i32_0 = arith.constant 0 : i32
    %c0_i32_1 = arith.constant 0 : i32
    return %c0_i32, %c0_i32_0 : i32, i32
  }
  func.func @transform_9(%arg0: i32) -> (i32, i32) {
    %c0_i32 = arith.constant 0 : i32
    %c0_i32_0 = arith.constant 0 : i32
    return %arg0, %c0_i32 : i32, i32
  }
}

</mosaic_0001>

<bundles_post_ra>
// kernel: tpu_custom_call.1
= control target key start
LH: loop header
LB: loop body
LE: loop exit
PB: predicated region body
PF: predicated region fallthrough
CT: control target
= control target key end

     0   :  { %14 = vsyncpa [#allocation3], 0  ;;  %s436_s0 = inlined_call_operand.vmem [shape: f32[8,4], index: 0, kind: input, shape index: {}]   ;;  %s437_s1 = inlined_call_operand.vmem [shape: f32[4,50], index: 1, kind: input, shape index: {}]   ;;  %s438_s2 = inlined_call_operand.vmem [shape: f32[1,50], index: 2, kind: input, shape index: {}]   ;;  %s439_s3 = inlined_call_operand.vmem [shape: f32[50,50], index: 3, kind: input, shape index: {}]   ;;  %s440_s4 = inlined_call_operand.vmem [shape: f32[1,50], index: 4, kind: input, shape index: {}]   ;;  %s441_s5 = inlined_call_operand.hbm [shape: f32[50,50], index: 5, kind: input, shape index: {}]   ;;  %s442_s6 = inlined_call_operand.vmem [shape: f32[1,50], index: 6, kind: input, shape index: {}]   ;;  %s443_s7 = inlined_call_operand.vmem [shape: f32[50,8], index: 7, kind: input, shape index: {}]   ;;  %s444_s8 = inlined_call_operand.vmem [shape: f32[1,8], index: 8, kind: input, shape index: {}]   ;;  %s445_s9 = inlined_call_operand.hbm [shape: f32[8,8], index: 9, kind: output, shape index: {}]  }
   0x1   :  { %15 = vsyncpa [#allocation4], 0  ;;  %s30_s11 = sshll.u32 %s441_s5, 4  ;;  %s310_s12 = smov [#allocation2]   ;;  %s31_s11 = int_to_ptr.hbm [resolvable:$true] %s30_s11 }
   0x2   :  { %s32_s13 = sshll.u32 %s310_s12, 4  ;;  %s311_s14 = smov 128   ;;  %s33_s13 = int_to_ptr.vmem [resolvable:$true] %s32_s13 }
   0x3   :  { %s312_s15 = smov 8  }
   0x4   :  { %38 = dma.hbm_to_vmem [thread:$0]  %s31_s11, 896, %s33_s13, [#allocation3], %s311_s14, %s311_s14, %s312_s15  }
   0x5   :  { %306 = dma.done.wait [#allocation3], 896  }
   0x6   :  { %307 = vsyncadd [#allocation3], 4294966400  ;;  %vm59_vm0 = vcmask 1043456   ;;  %vm99_vm1 = vcmask 1041408   ;;  %vm55_vm2 = vcmask 31744   ;;  %v49_v1 = vld [vmem:[%s436_s0] sm:$0xff] }
   0x7   :  { %v50_v0 = vld [vmem:[%s437_s1] sm:$0xf]  ;;  %v90_v2 = vld [vmem:[%s439_s3 + $0x30] sm:$0x3]  ;;  %v89_v3 = vld [vmem:[%s439_s3 + $0x28] sm:$0xff]  ;;  %vm95_vm3 = vcmask 408576  }
   0x8   :  { %237 = vmatpush.msk.msra.mxu0 %vm59_vm0, %v50_v0  ;;  %239 = vmatpush.msk.msra.mxu1 %vm99_vm1, %v90_v2  ;;  %v88_v4 = vld [vmem:[%s439_s3 + $0x20] sm:$0xff]  ;;  %v87_v5 = vld [vmem:[%s439_s3 + $0x18] sm:$0xff]  ;;  %v86_v6 = vld [vmem:[%s439_s3 + $0x10] sm:$0xff]  ;;  %vm218_vm7 = vcmask 64512  }
   0x9   :  { %238 = vmatmul.msk.f32.vlgmr.msra.gmra.mxu0 %vm55_vm2, %v49_v1  ;;  %v85_v7 = vld [vmem:[%s439_s3 + $0x8] sm:$0xff]  ;;  %v84_v8 = vld [vmem:[%s439_s3] sm:$0xff]  ;;  %v130_v9 = vld [vmem:[#allocation2 + $0x30] sm:$0x3] }
   0xa   :  { %113 = vmatpush.msra.mxu1 %v89_v3  ;;  %v129_v10 = vld [vmem:[#allocation2 + $0x28] sm:$0xff]  ;;  %241 = vmatpush.msk.msra.mxu2 %vm99_vm1, %v130_v9  ;;  %v128_v11 = vld [vmem:[#allocation2 + $0x20] sm:$0xff]  ;;  %v127_v12 = vld [vmem:[#allocation2 + $0x18] sm:$0xff] }
   0xb   :  { %v250_v13 = vld [vmem:[%s438_s2] ss:$0 sm:$0xff]  ;;  %v126_v17 = vld [vmem:[#allocation2 + $0x10] sm:$0xff]  ;;  %v125_v18 = vld [vmem:[#allocation2 + $0x8] sm:$0xff] }
   0xc   :  { %114 = vmatpush.msra.mxu1 %v88_v4  ;;  %151 = vmatpush.msra.mxu2 %v129_v10  ;;  %v124_v19 = vld [vmem:[#allocation2] sm:$0xff]  ;;  %v168_v20 = vld [vmem:[%s443_s7 + $0x30] sm:$0x3]  ;;  %v167_v21 = vld [vmem:[%s443_s7 + $0x28] sm:$0xff] }
   0xd   :  { %243 = vmatpush.msk.msra.mxu3 %vm99_vm1, %v168_v20  ;;  %v166_v22 = vld [vmem:[%s443_s7 + $0x20] sm:$0xff]  ;;  %v165_v23 = vld [vmem:[%s443_s7 + $0x18] sm:$0xff]  ;;  %v164_v28 = vld [vmem:[%s443_s7 + $0x10] sm:$0xff] }
   0xe   :  { %115 = vmatpush.msra.mxu1 %v87_v5  ;;  %152 = vmatpush.msra.mxu2 %v128_v11  ;;  %v251_v24 = vld [vmem:[%s440_s4] ss:$0 sm:$0xff]  ;;  %v163_v29 = vld [vmem:[%s443_s7 + $0x8] sm:$0xff] }
   0xf   :  { %189 = vmatpush.msra.mxu3 %v167_v21  ;;  %v162_v30 = vld [vmem:[%s443_s7] sm:$0xff] }
  0x10   :  { %116 = vmatpush.msra.mxu1 %v86_v6  ;;  %153 = vmatpush.msra.mxu2 %v127_v12  ;;  %v252_v31 = vld [vmem:[%s442_s6] ss:$0 sm:$0xff]  ;;  %s313_s6 = smov [#allocation5]  }
  0x11   :  { %190 = vmatpush.msra.mxu3 %v166_v22  ;;  %v253_v35 = vld [vmem:[%s444_s8] ss:$0 sm:$0xff]  ;;  %s225_s7 = sshll.u32 %s313_s6, 4  ;;  %s227_s8 = sshll.u32 %s445_s9, 4  ;;  %s226_s7 = int_to_ptr.vmem [resolvable:$true] %s225_s7  ;;  %s228_s8 = int_to_ptr.hbm [resolvable:$true] %s227_s8 }
  0x12   :  { %117 = vmatpush.msra.mxu1 %v85_v7  ;;  %154 = vmatpush.msra.mxu2 %v126_v17 }
  0x13   :  { %191 = vmatpush.msra.mxu3 %v165_v23 }
  0x14   :  { %118 = vmatpush.msra.mxu1 %v84_v8  ;;  %155 = vmatpush.msra.mxu2 %v125_v18 }
  0x15   :  { %192 = vmatpush.msra.mxu3 %v164_v28 }
  0x16   :  { %156 = vmatpush.msra.mxu2 %v124_v19 }
  0x17   :  { %193 = vmatpush.msra.mxu3 %v163_v29 }
  0x19   :  { %194 = vmatpush.msra.mxu3 %v162_v30 }
  0x86   :  { %v80_v14 = vpop.f32.mrf.mxu0 }
  0x87   :  { %v81_v15 = vadd.f32 %v250_v13, %v80_v14 }
  0x89   :  { %v83_v16 = vmax.f32 %v81_v15, 0.0 }
  0x8b   :  { %240 = vmatmul.msk.f32.vlgmr.msra.gmra.mxu1 %vm95_vm3, %v83_v16 }
 0x108   :  { %v120_v25 = vpop.f32.mrf.mxu1 }
 0x109   :  { %v121_v26 = vadd.f32 %v251_v24, %v120_v25 }
 0x10b   :  { %v123_v27 = vmax.f32 %v121_v26, 0.0 }
 0x10d   :  { %242 = vmatmul.msk.f32.vlgmr.msra.gmra.mxu2 %vm95_vm3, %v123_v27 }
 0x190   :  { %v158_v32 = vpop.f32.mrf.mxu2 }
 0x191   :  { %v159_v33 = vadd.f32 %v252_v31, %v158_v32 }
 0x193   :  { %v161_v34 = vmax.f32 %v159_v33, 0.0 }
 0x195   :  { %244 = vmatmul.msk.f32.vlgmr.msra.gmra.mxu3 %vm95_vm3, %v161_v34 }
 0x218   :  { %v196_v36 = vpop.f32.mrf.mxu3 }
 0x219   :  { %v197_v37 = vadd.f32 %v253_v35, %v196_v36 }
 0x21b   :  { %v245_v38 = vmul.f32 -1.442695, %v197_v37 }
 0x21d   :  { %254 = vpow2.f32 %v245_v38 }
 0x223   :  { %v255_v39 = vpop.eup %254 }
 0x224   :  { %v202_v40 = vadd.f32 1.0, %v255_v39 }
 0x226   :  { %256 = vrcp.f32 %v202_v40  ;;  %v214_v44 = vand.u32 2147483648, %v202_v40  ;;  %v212_v46 = vand.u32 2147483647, %v202_v40  ;;  %vm208_vm5 = vweird.f32 %v202_v40 }
 0x228   :  { %v215_v48 = vor.u32 1.1754944e-38, %v214_v44  ;;  %vm213_vm8 = vcmp.eq.f32.partialorder %v212_v46, 8.507059e+37 }
 0x22c   :  { %v257_v41 = vpop.eup %256 }
 0x22d   :  { %v204_v42 = vmul.f32 %v257_v41, %v202_v40  ;;  %vm209_vm4 = vweird.f32 %v257_v41 }
 0x22e   :  { %vm210_vm6 = vmor %vm208_vm5, %vm209_vm4 }
 0x22f   :  { %v205_v43 = vsub.f32 1.0, %v204_v42 }
 0x231   :  { %v206_v45 = vmul.f32 %v257_v41, %v205_v43 }
 0x233   :  { %v207_v47 = vadd.f32 %v257_v41, %v206_v45 }
 0x235   :  { %v211_v49 = vsel %vm210_vm6, %v257_v41, %v207_v47 }
 0x236   :  { %v216_v50 = vsel %vm213_vm8, %v215_v48, %v211_v49 }
 0x237   :  { %219 = vst.msk [vmem:[#allocation5] sm:$0xff] %vm218_vm7, %v216_v50 }
 0x238   :  { %230 = dma.vmem_to_hbm [thread:$0]  %s226_s7, 128, %s228_s8, [#allocation4]  }
 0x239   :  { %308 = dma.done.wait [#allocation4], 128  }
 0x23a   :  { %309 = vsyncadd [#allocation4], 4294967168 }
 0x23b   :  { %235 = vsyncpa [#allocation3], 1 }
 0x23c   :  { %236 = vsyncpa [#allocation4], 1 }

</bundles_post_ra>
